<compile_context>
chip_gen: v6e
topology: v6e:2x2x1
jax: 0.10.0
libtpu: 0.0.40
codegen_flags: <defaults>
</compile_context>

<pallas_src>
import jax
import jax.numpy as jnp
from jax.experimental import pallas as pl
from jax.experimental.pallas import tpu as pltpu

_PAD = 128          # lane-dense padded width for the fc output
_BN_EPS = 1e-5
_NEG_BIG = -1e30    # bias value for padded fc lanes -> exp() underflows to 0


def _cls_kernel(x_ref, w1_ref, bnp_ref, w2_ref, b2_ref, bottle_ref, fc_ref):
    x = x_ref[...]
    b1 = bnp_ref[0:1, :]
    gamma = bnp_ref[1:2, :]
    beta = bnp_ref[2:3, :]

    # ---- bottleneck Linear: (B, in_dim) @ (in_dim, bn_dim) + b1 ----
    y1 = jnp.dot(x, w1_ref[...], preferred_element_type=jnp.float32) + b1
    bottle_ref[...] = y1

    # ---- BatchNorm1d (training-mode batch stats, biased var), folded ----
    inv_b = 1.0 / y1.shape[0]
    mean = jnp.sum(y1, axis=0, keepdims=True) * inv_b
    meansq = jnp.sum(y1 * y1, axis=0, keepdims=True) * inv_b
    var = jnp.maximum(meansq - mean * mean, 0.0)
    scale = gamma * jax.lax.rsqrt(var + _BN_EPS)
    shift = beta - mean * scale
    h = y1 * scale + shift

    # ---- LeakyReLU(0.2): max(h, 0.2*h) ----
    h = jnp.maximum(h, 0.2 * h)

    # ---- fc Linear: (B, bn_dim) @ (bn_dim, PAD) + b2  (lane-dense padded) ----
    logits = jnp.dot(h, w2_ref[...], preferred_element_type=jnp.float32) + b2_ref[...]

    # ---- Softmax over last dim (padded lanes carry -1e30 -> exp == 0) ----
    m = jnp.max(logits, axis=-1, keepdims=True)
    e = jnp.exp(logits - m)
    inv_sum = pl.reciprocal(jnp.sum(e, axis=-1, keepdims=True), approx=True)
    probs = e * inv_sum

    # Single lane-dense output slab: [:, :128] = logits, [:, 128:] = probs.
    pad = logits.shape[-1]
    fc_ref[:, :pad] = logits
    fc_ref[:, pad:] = probs


def cls_forward(x, w1, b1, gamma, beta, w2, b2):
    """Returns [x, bottleneck_out, logits, probs] matching CLS.forward."""
    B, _ = x.shape
    bn_dim = w1.shape[1]
    out_dim = w2.shape[1]

    # Pack the three (1, bn_dim) parameter rows into one input (one DMA).
    bn_params = jnp.concatenate(
        [b1.reshape(1, bn_dim), gamma.reshape(1, bn_dim), beta.reshape(1, bn_dim)],
        axis=0)

    # Pad fc weight/bias to a lane-dense 128-wide output.  Padded bias lanes
    # get -1e30 so they contribute exp()==0 to the softmax normalizer.
    w2p = jnp.zeros((bn_dim, _PAD), jnp.float32).at[:, :out_dim].set(w2)
    b2p = jnp.full((1, _PAD), _NEG_BIG, jnp.float32).at[:, :out_dim].set(
        b2.reshape(1, out_dim))

    vmem_full = lambda shape: pl.BlockSpec(
        shape, lambda: tuple(0 for _ in shape), memory_space=pltpu.MemorySpace.VMEM)

    bottle, fc_slab = pl.pallas_call(
        _cls_kernel,
        grid=(),
        in_specs=[
            vmem_full(x.shape),
            vmem_full(w1.shape),
            vmem_full(bn_params.shape),
            vmem_full(w2p.shape),
            vmem_full(b2p.shape),
        ],
        out_specs=(
            vmem_full((B, bn_dim)),
            vmem_full((B, 2 * _PAD)),
        ),
        out_shape=(
            jax.ShapeDtypeStruct((B, bn_dim), jnp.float32),
            jax.ShapeDtypeStruct((B, 2 * _PAD), jnp.float32),
        ),
    )(x, w1, bn_params, w2p, b2p)

    logits = fc_slab[:, :out_dim]
    probs = fc_slab[:, _PAD:_PAD + out_dim]
    return [x, bottle, logits, probs]


def _reference(x, w1, b1, gamma, beta, w2, b2):
    """Pure-JAX reference of CLS.forward (training-mode BatchNorm1d)."""
    hi = jax.lax.Precision.HIGHEST
    y1 = jnp.dot(x, w1, precision=hi) + b1
    mean = jnp.mean(y1, axis=0, keepdims=True)
    var = jnp.mean((y1 - mean) ** 2, axis=0, keepdims=True)
    h = (y1 - mean) * jax.lax.rsqrt(var + _BN_EPS) * gamma + beta
    h = jnp.where(h >= 0.0, h, 0.2 * h)
    logits = jnp.dot(h, w2, precision=hi) + b2
    probs = jax.nn.softmax(logits, axis=-1)
    return y1, logits, probs


if __name__ == "__main__":
    # Small shapes consistent with the module: batch=8, in_dim=32,
    # bottle_neck_dim=256 (module default), out_dim=8.
    B, IN_DIM, BN_DIM, OUT_DIM = 8, 32, 256, 8

    key = jax.random.PRNGKey(0)
    kx, kw1, kb1, kw2, kb2 = jax.random.split(key, 5)

    x = jax.random.normal(kx, (B, IN_DIM), dtype=jnp.float32)

    # Deterministic parameter init (uniform, like torch Linear default scale).
    lim1 = 1.0 / (IN_DIM ** 0.5)
    w1 = jax.random.uniform(kw1, (IN_DIM, BN_DIM), jnp.float32, -lim1, lim1)
    b1 = jax.random.uniform(kb1, (1, BN_DIM), jnp.float32, -lim1, lim1)

    gamma = jnp.ones((1, BN_DIM), jnp.float32)   # BatchNorm1d weight
    beta = jnp.zeros((1, BN_DIM), jnp.float32)   # BatchNorm1d bias

    lim2 = 1.0 / (BN_DIM ** 0.5)
    w2 = jax.random.uniform(kw2, (BN_DIM, OUT_DIM), jnp.float32, -lim2, lim2)
    b2 = jax.random.uniform(kb2, (1, OUT_DIM), jnp.float32, -lim2, lim2)

    outs = cls_forward(x, w1, b1, gamma, beta, w2, b2)
    jax.block_until_ready(outs)

    ref_bottle, ref_logits, ref_probs = _reference(x, w1, b1, gamma, beta, w2, b2)

    # Sanity checks (probs tolerance relaxed for approx reciprocal).
    assert outs[1].shape == (B, BN_DIM)
    assert outs[2].shape == (B, OUT_DIM)
    assert outs[3].shape == (B, OUT_DIM)
    assert jnp.allclose(outs[1], ref_bottle, atol=5e-3, rtol=5e-3)
    assert jnp.allclose(outs[2], ref_logits, atol=5e-3, rtol=5e-3)
    assert jnp.allclose(outs[3], ref_probs, atol=2e-2, rtol=2e-2)
    assert jnp.allclose(jnp.sum(outs[3], axis=-1), 1.0, atol=1e-2)
    print("KERNEL_OK")
</pallas_src>

<mosaic_0001>
module attributes {stable_mosaic.version = 11 : i64} {
  func.func @_cls_kernel(%arg0: memref<8x32xf32, #tpu.memory_space<vmem>>, %arg1: memref<32x256xf32, #tpu.memory_space<vmem>>, %arg2: memref<3x256xf32, #tpu.memory_space<vmem>>, %arg3: memref<256x128xf32, #tpu.memory_space<vmem>>, %arg4: memref<1x128xf32, #tpu.memory_space<vmem>>, %arg5: memref<8x256xf32, #tpu.memory_space<vmem>>, %arg6: memref<8x256xf32, #tpu.memory_space<vmem>>) attributes {dimension_semantics = [], scalar_prefetch = 0 : i64, scratch_operands = 0 : i64, tpu.core_type = #tpu.core_type<tc>} {
    %c0 = arith.constant 0 : index
    %c0_0 = arith.constant 0 : index
    %0 = vector.load %arg0[%c0, %c0_0] : memref<8x32xf32, #tpu.memory_space<vmem>>, vector<8x32xf32>
    %c0_1 = arith.constant 0 : index
    %c0_2 = arith.constant 0 : index
    %1 = vector.load %arg2[%c0_1, %c0_2] : memref<3x256xf32, #tpu.memory_space<vmem>>, vector<1x256xf32>
    %c1 = arith.constant 1 : index
    %c0_3 = arith.constant 0 : index
    %2 = vector.load %arg2[%c1, %c0_3] : memref<3x256xf32, #tpu.memory_space<vmem>>, vector<1x256xf32>
    %c2 = arith.constant 2 : index
    %c0_4 = arith.constant 0 : index
    %3 = vector.load %arg2[%c2, %c0_4] : memref<3x256xf32, #tpu.memory_space<vmem>>, vector<1x256xf32>
    %c0_5 = arith.constant 0 : index
    %c0_6 = arith.constant 0 : index
    %4 = vector.load %arg1[%c0_5, %c0_6] : memref<32x256xf32, #tpu.memory_space<vmem>>, vector<32x256xf32>
    %cst = arith.constant dense<0.000000e+00> : vector<8x256xf32>
    %5 = tpu.matmul %0, %4, %cst {dimension_numbers = #tpu.dot_dimension_numbers<[1], [0], [0], [1], [0, 0, 1, 1], [], []>} : vector<8x32xf32>, vector<32x256xf32>, vector<8x256xf32> -> vector<8x256xf32>
    %6 = vector.broadcast %1 : vector<1x256xf32> to vector<8x256xf32>
    %7 = arith.addf %5, %6 : vector<8x256xf32>
    %c0_7 = arith.constant 0 : index
    %c0_8 = arith.constant 0 : index
    %8 = vector.load %arg5[%c0_7, %c0_8] : memref<8x256xf32, #tpu.memory_space<vmem>>, vector<8x256xf32>
    tpu.vector_store %arg5[%c0_7, %c0_8], %7 {strides = array<i32>} : memref<8x256xf32, #tpu.memory_space<vmem>>, vector<8x256xf32>,
    %cst_9 = arith.constant dense<0.000000e+00> : vector<256xf32>
    %9 = vector.multi_reduction <add>, %7, %cst_9 [0] : vector<8x256xf32> to vector<256xf32>
    %10 = vector.shape_cast %9 : vector<256xf32> to vector<1x256xf32>
    %cst_10 = arith.constant 1.250000e-01 : f32
    %11 = vector.broadcast %cst_10 : f32 to vector<1x256xf32>
    %12 = arith.mulf %10, %11 : vector<1x256xf32>
    %13 = arith.mulf %7, %7 : vector<8x256xf32>
    %cst_11 = arith.constant dense<0.000000e+00> : vector<256xf32>
    %14 = vector.multi_reduction <add>, %13, %cst_11 [0] : vector<8x256xf32> to vector<256xf32>
    %15 = vector.shape_cast %14 : vector<256xf32> to vector<1x256xf32>
    %cst_12 = arith.constant 1.250000e-01 : f32
    %16 = vector.broadcast %cst_12 : f32 to vector<1x256xf32>
    %17 = arith.mulf %15, %16 : vector<1x256xf32>
    %18 = arith.mulf %12, %12 : vector<1x256xf32>
    %19 = arith.subf %17, %18 : vector<1x256xf32>
    %cst_13 = arith.constant 0.000000e+00 : f32
    %20 = vector.broadcast %cst_13 : f32 to vector<1x256xf32>
    %21 = arith.maximumf %19, %20 : vector<1x256xf32>
    %cst_14 = arith.constant 9.99999974E-6 : f32
    %22 = vector.broadcast %cst_14 : f32 to vector<1x256xf32>
    %23 = arith.addf %21, %22 : vector<1x256xf32>
    %24 = math.rsqrt %23 : vector<1x256xf32>
    %25 = arith.mulf %2, %24 : vector<1x256xf32>
    %26 = arith.mulf %12, %25 : vector<1x256xf32>
    %27 = arith.subf %3, %26 : vector<1x256xf32>
    %28 = vector.broadcast %25 : vector<1x256xf32> to vector<8x256xf32>
    %29 = arith.mulf %7, %28 : vector<8x256xf32>
    %30 = vector.broadcast %27 : vector<1x256xf32> to vector<8x256xf32>
    %31 = arith.addf %29, %30 : vector<8x256xf32>
    %cst_15 = arith.constant 2.000000e-01 : f32
    %32 = vector.broadcast %cst_15 : f32 to vector<8x256xf32>
    %33 = arith.mulf %32, %31 : vector<8x256xf32>
    %34 = arith.maximumf %31, %33 : vector<8x256xf32>
    %c0_16 = arith.constant 0 : index
    %c0_17 = arith.constant 0 : index
    %35 = vector.load %arg3[%c0_16, %c0_17] : memref<256x128xf32, #tpu.memory_space<vmem>>, vector<256x128xf32>
    %cst_18 = arith.constant dense<0.000000e+00> : vector<8x128xf32>
    %36 = tpu.matmul %34, %35, %cst_18 {dimension_numbers = #tpu.dot_dimension_numbers<[1], [0], [0], [1], [0, 0, 1, 1], [], []>} : vector<8x256xf32>, vector<256x128xf32>, vector<8x128xf32> -> vector<8x128xf32>
    %c0_19 = arith.constant 0 : index
    %c0_20 = arith.constant 0 : index
    %37 = vector.load %arg4[%c0_19, %c0_20] : memref<1x128xf32, #tpu.memory_space<vmem>>, vector<1x128xf32>
    %38 = vector.broadcast %37 : vector<1x128xf32> to vector<8x128xf32>
    %39 = arith.addf %36, %38 : vector<8x128xf32>
    %cst_21 = arith.constant dense<0xFF800000> : vector<8xf32>
    %40 = vector.multi_reduction <maximumf>, %39, %cst_21 [1] : vector<8x128xf32> to vector<8xf32>
    %41 = vector.shape_cast %40 : vector<8xf32> to vector<8x1xf32>
    %42 = vector.broadcast %41 : vector<8x1xf32> to vector<8x128xf32>
    %43 = arith.subf %39, %42 : vector<8x128xf32>
    %44 = math.exp %43 : vector<8x128xf32>
    %cst_22 = arith.constant dense<0.000000e+00> : vector<8xf32>
    %45 = vector.multi_reduction <add>, %44, %cst_22 [1] : vector<8x128xf32> to vector<8xf32>
    %46 = vector.shape_cast %45 : vector<8xf32> to vector<8x1xf32>
    %47 = tpu.reciprocal %46 {approx = true} : vector<8x1xf32> -> vector<8x1xf32>
    %48 = vector.broadcast %47 : vector<8x1xf32> to vector<8x128xf32>
    %49 = arith.mulf %44, %48 : vector<8x128xf32>
    %c0_23 = arith.constant 0 : index
    %c0_24 = arith.constant 0 : index
    %50 = vector.load %arg6[%c0_23, %c0_24] : memref<8x256xf32, #tpu.memory_space<vmem>>, vector<8x128xf32>
    tpu.vector_store %arg6[%c0_23, %c0_24], %39 {strides = array<i32>} : memref<8x256xf32, #tpu.memory_space<vmem>>, vector<8x128xf32>,
    %c0_25 = arith.constant 0 : index
    %c128 = arith.constant 128 : index
    %51 = vector.load %arg6[%c0_25, %c128] : memref<8x256xf32, #tpu.memory_space<vmem>>, vector<8x128xf32>
    tpu.vector_store %arg6[%c0_25, %c128], %49 {strides = array<i32>} : memref<8x256xf32, #tpu.memory_space<vmem>>, vector<8x128xf32>,
    return
  }
}

</mosaic_0001>

<bundles_post_ra>
// kernel: tpu_custom_call.1
= control target key start
LH: loop header
LB: loop body
LE: loop exit
PB: predicated region body
PF: predicated region fallthrough
CT: control target
= control target key end

     0   :  { %12 = vsyncpa [#allocation3], 0  ;;  %s711_s0 = inlined_call_operand.hbm [shape: f32[8,32], index: 0, kind: input, shape index: {}]   ;;  %s712_s1 = inlined_call_operand.hbm [shape: f32[32,256], index: 1, kind: input, shape index: {}]   ;;  %s713_s2 = inlined_call_operand.hbm [shape: f32[3,256], index: 2, kind: input, shape index: {}]   ;;  %s714_s3 = inlined_call_operand.hbm [shape: f32[256,128], index: 3, kind: input, shape index: {}]   ;;  %s715_s4 = inlined_call_operand.vmem [shape: f32[1,128], index: 4, kind: input, shape index: {}]   ;;  %s716_s5 = inlined_call_operand.hbm [shape: f32[8,256], index: 5, kind: output, shape index: {0}]   ;;  %s717_s6 = inlined_call_operand.hbm [shape: f32[8,256], index: 6, kind: output, shape index: {1}]  }
   0x1   :  { %13 = vsyncpa [#allocation6], 0 }
   0x2   :  { %14 = vsyncpa [#allocation9], 0 }
   0x3   :  { %15 = vsyncpa [#allocation4], 0 }
   0x4   :  { %16 = vsyncpa [#allocation12], 0  ;;  %s625_s21 = smov [#allocation5]  }
   0x5   :  { %s32_s22 = sshll.u32 %s625_s21, 4  ;;  %s33_s22 = int_to_ptr.vmem [resolvable:$true] %s32_s22 }
   0x6   :  { %s503_s23 = scalar_lea.vmem %s33_s22, 1024  ;;  %p508_p1 = scmp.lt.s32.totalorder %s33_s22, %s33_s22 }
   0x7   :  { %p504_p0 = scmp.ne.s32.totalorder %s33_s22, %s503_s23  ;;  %p509_p2 = scmp.lt.s32.totalorder %s503_s23, %s503_s23 }
   0x9   :  { %p510_p3 = por %p509_p2, %p508_p1 }
   0xb   :  { %p511_p4 = pnand %p510_p3, %p504_p0 }
   0xd   :  { %514 = shalt.err (!%p511_p4)
}
   0xe   :  { %s626_s24 = smov 256   ;;  %s627_s25 = smov 16  }
   0xf   :  { %38 = dma.hbm_to_vmem [thread:$0]  %s712_s1, 1024, %s33_s22, [#allocation6], %s626_s24, %s626_s24, %s627_s25  }
  0x10   :  { %s628_s28 = smov [#allocation2]   ;;  %s629_s30 = smov [#allocation7]  }
  0x11   :  { %s23_s29 = sshll.u32 %s628_s28, 4  ;;  %s45_s7 = sshll.u32 %s629_s30, 4  ;;  %s24_s29 = int_to_ptr.vmem [resolvable:$true] %s23_s29  ;;  %s46_s7 = int_to_ptr.vmem [resolvable:$true] %s45_s7 }
  0x12   :  { %s523_s8 = scalar_lea.vmem %s24_s29, 128  ;;  %p528_p6 = scmp.lt.s32.totalorder %s24_s29, %s24_s29 }
  0x13   :  { %p524_p5 = scmp.ne.s32.totalorder %s24_s29, %s523_s8  ;;  %p529_p7 = scmp.lt.s32.totalorder %s523_s8, %s523_s8 }
  0x15   :  { %p530_p8 = por %p529_p7, %p528_p6 }
  0x17   :  { %p531_p9 = pnand %p530_p8, %p524_p5 }
  0x19   :  { %534 = shalt.err (!%p531_p9)
}
  0x1a   :  { %26 = dma.hbm_to_vmem [thread:$0]  %s711_s0, 128, %s24_s29, [#allocation3]  }
  0x1b   :  { %s543_s11 = scalar_lea.vmem %s46_s7, 128  ;;  %p548_p11 = scmp.lt.s32.totalorder %s46_s7, %s46_s7 }
  0x1c   :  { %p544_p10 = scmp.ne.s32.totalorder %s46_s7, %s543_s11  ;;  %p549_p12 = scmp.lt.s32.totalorder %s543_s11, %s543_s11 }
  0x1e   :  { %p550_p13 = por %p549_p12, %p548_p11 }
  0x20   :  { %p551_p0 = pnand %p550_p13, %p544_p10 }
  0x22   :  { %554 = shalt.err (!%p551_p0)
}
  0x23   :  { %48 = dma.hbm_to_vmem [thread:$0]  %s713_s2, 128, %s46_s7, [#allocation6]  }
  0x24   :  { %s630_s13 = smov [#allocation8]  }
  0x25   :  { %s54_s14 = sshll.u32 %s630_s13, 4  ;;  %s55_s14 = int_to_ptr.vmem [resolvable:$true] %s54_s14 }
  0x26   :  { %s563_s15 = scalar_lea.vmem %s55_s14, 4096  ;;  %p568_p2 = scmp.lt.s32.totalorder %s55_s14, %s55_s14 }
  0x27   :  { %p564_p1 = scmp.ne.s32.totalorder %s55_s14, %s563_s15  ;;  %p569_p3 = scmp.lt.s32.totalorder %s563_s15, %s563_s15 }
  0x29   :  { %p570_p4 = por %p569_p3, %p568_p2 }
  0x2b   :  { %p571_p5 = pnand %p570_p4, %p564_p1 }
  0x2d   :  { %574 = shalt.err (!%p571_p5)
}
  0x2e   :  { %s631_s0 = smov 128   ;;  %s632_s16 = smov 8  }
  0x2f   :  { %60 = dma.hbm_to_vmem [thread:$0]  %s714_s3, 4096, %s55_s14, [#allocation9], %s631_s0, %s631_s0, %s632_s16  }
  0x30   :  { %615 = dma.done.wait [#allocation3], 128  }
  0x31   :  { %616 = vsyncadd [#allocation3], 4294967168 }
  0x32   :  { %617 = dma.done.wait [#allocation6], 1152  }
  0x33   :  { %618 = vsyncadd [#allocation6], 4294966144 }
  0x34   :  { %619 = dma.done.wait [#allocation9], 4096  }
  0x35   :  { %620 = vsyncadd [#allocation9], 4294963200  ;;  %v633_v0 = vmov 0.0   ;;  %v88_v1 = vld [vmem:[#allocation5 + $0x38] sm:$0xff]  ;;  %v87_v2 = vld [vmem:[#allocation5 + $0x30] sm:$0xff]  ;;  %vm100_vm0 = vcmask 261120   ;;  %v90_v42 = vlaneseq }
  0x36   :  { %168 = vmatprep.mubr.f32.mxu0 %v633_v0  ;;  %v86_v3 = vld [vmem:[#allocation5 + $0x28] sm:$0xff]  ;;  %128 = vmatprep.subr.mxu0 %v88_v1  ;;  %v85_v4 = vld [vmem:[#allocation5 + $0x20] sm:$0xff]  ;;  %v84_v5 = vld [vmem:[#allocation5 + $0x18] sm:$0xff]  ;;  %s635_s19 = smov [#allocation10]  }
  0x37   :  { %129 = vmatpush1.msra.mxu0 %v87_v2  ;;  %v83_v6 = vld [vmem:[#allocation5 + $0x10] sm:$0xff]  ;;  %v82_v7 = vld [vmem:[#allocation5 + $0x8] sm:$0xff]  ;;  %v81_v8 = vld [vmem:[#allocation5] sm:$0xff]  ;;  %v91_v43 = vshrl.u32 %v90_v42, 7  ;;  %s413_s20 = sshll.u32 %s635_s19, 4  ;;  %s414_s20 = int_to_ptr.vmem [resolvable:$true] %s413_s20 }
  0x38   :  { %130 = vmatprep.subr.mxu0 %v86_v3  ;;  %v75_v9 = vld [vmem:[#allocation2] sm:$0xff]  ;;  %v318_v10 = vld [vmem:[#allocation8 + $0xf8] sm:$0xff]  ;;  %v316_v14 = vld [vmem:[#allocation8 + $0xe8] sm:$0xff]  ;;  %s575_s21 = scalar_lea.vmem %s414_s20, 256  ;;  %p580_p7 = scmp.lt.s32.totalorder %s414_s20, %s414_s20 }
  0x39   :  { %131 = vmatpush1.msra.mxu0 %v85_v4  ;;  %v302_v11 = vld [vmem:[#allocation8 + $0x78] sm:$0xff]  ;;  %v317_v12 = vld [vmem:[#allocation8 + $0xf0] sm:$0xff]  ;;  %440 = vmatprep.subr.mxu1 %v318_v10  ;;  %v300_v15 = vld [vmem:[#allocation8 + $0x68] sm:$0xff]  ;;  %v684_v44 = vsub.s32 0, %v91_v43  ;;  %v686_v46 = vsub.s32 1, %v91_v43  ;;  %p576_p6 = scmp.ne.s32.totalorder %s414_s20, %s575_s21  ;;  %p581_p8 = scmp.lt.s32.totalorder %s575_s21, %s575_s21 }
  0x3a   :  { %132 = vmatprep.subr.mxu0 %v84_v5  ;;  %v301_v13 = vld [vmem:[#allocation8 + $0x70] sm:$0xff]  ;;  %441 = vmatpush3.msra.mxu1 %v302_v11  ;;  %v315_v16 = vld [vmem:[#allocation8 + $0xe0] sm:$0xff]  ;;  %v314_v18 = vld [vmem:[#allocation8 + $0xd8] sm:$0xff] }
  0x3b   :  { %133 = vmatpush1.msra.mxu0 %v83_v6  ;;  %442 = vmatprep.subr.mxu1 %v317_v12  ;;  %v299_v17 = vld [vmem:[#allocation8 + $0x60] sm:$0xff]  ;;  %v298_v19 = vld [vmem:[#allocation8 + $0x58] sm:$0xff]  ;;  %v313_v20 = vld [vmem:[#allocation8 + $0xd0] sm:$0xff]  ;;  %p582_p9 = por %p581_p8, %p580_p7 }
  0x3c   :  { %134 = vmatprep.subr.mxu0 %v82_v7  ;;  %443 = vmatpush3.msra.mxu1 %v301_v13  ;;  %v297_v21 = vld [vmem:[#allocation8 + $0x50] sm:$0xff]  ;;  %v312_v22 = vld [vmem:[#allocation8 + $0xc8] sm:$0xff]  ;;  %v311_v24 = vld [vmem:[#allocation8 + $0xc0] sm:$0xff] }
  0x3d   :  { %135 = vmatpush1.msra.mxu0 %v81_v8  ;;  %444 = vmatprep.subr.mxu1 %v316_v14  ;;  %v296_v23 = vld [vmem:[#allocation8 + $0x48] sm:$0xff]  ;;  %v295_v25 = vld [vmem:[#allocation8 + $0x40] sm:$0xff]  ;;  %v310_v26 = vld [vmem:[#allocation8 + $0xb8] sm:$0xff]  ;;  %p583_p10 = pnand %p582_p9, %p576_p6 }
  0x3e   :  { %438 = vmatmul.mubr.msk.f32.vlgmr.msra.gmra.mxu0 %vm100_vm0, %v75_v9  ;;  %445 = vmatpush3.msra.mxu1 %v300_v15  ;;  %v294_v27 = vld [vmem:[#allocation8 + $0x38] sm:$0xff]  ;;  %v309_v28 = vld [vmem:[#allocation8 + $0xb0] sm:$0xff]  ;;  %v308_v30 = vld [vmem:[#allocation8 + $0xa8] sm:$0xff] }
  0x3f   :  { %446 = vmatprep.subr.mxu1 %v315_v16  ;;  %v293_v29 = vld [vmem:[#allocation8 + $0x30] sm:$0xff]  ;;  %v292_v31 = vld [vmem:[#allocation8 + $0x28] sm:$0xff]  ;;  %v307_v32 = vld [vmem:[#allocation8 + $0xa0] sm:$0xff] }
  0x40   :  { %447 = vmatpush3.msra.mxu1 %v299_v17  ;;  %v291_v33 = vld [vmem:[#allocation8 + $0x20] sm:$0xff]  ;;  %v306_v34 = vld [vmem:[#allocation8 + $0x98] sm:$0xff]  ;;  %v305_v36 = vld [vmem:[#allocation8 + $0x90] sm:$0xff] }
  0x41   :  { %448 = vmatprep.subr.mxu1 %v314_v18  ;;  %v290_v35 = vld [vmem:[#allocation8 + $0x18] sm:$0xff]  ;;  %v289_v37 = vld [vmem:[#allocation8 + $0x10] sm:$0xff]  ;;  %v304_v38 = vld [vmem:[#allocation8 + $0x88] sm:$0xff] }
  0x42   :  { %449 = vmatpush3.msra.mxu1 %v298_v19  ;;  %v288_v39 = vld [vmem:[#allocation8 + $0x8] sm:$0xff]  ;;  %v303_v40 = vld [vmem:[#allocation8 + $0x80] sm:$0xff]  ;;  %v76_v45 = vld [vmem:[#allocation7] ss:$4 sm:$0x3] }
  0x43   :  { %450 = vmatprep.subr.mxu1 %v313_v20  ;;  %v287_v41 = vld [vmem:[#allocation8] sm:$0xff]  ;;  %v93_v47 = vrot.slane %v76_v45, %v684_v44  ;;  %v97_v48 = vrot.slane %v76_v45, %v686_v46 }
  0x44   :  { %451 = vmatpush3.msra.mxu1 %v297_v21 }
  0x45   :  { %452 = vmatprep.subr.mxu1 %v312_v22 }
  0x46   :  { %453 = vmatpush3.msra.mxu1 %v296_v23 }
  0x47   :  { %454 = vmatprep.subr.mxu1 %v311_v24 }
  0x48   :  { %455 = vmatpush3.msra.mxu1 %v295_v25 }
  0x49   :  { %456 = vmatprep.subr.mxu1 %v310_v26 }
  0x4a   :  { %457 = vmatpush3.msra.mxu1 %v294_v27  ;;  %v634_v27 = vmov 1966171168  }
  0x4b   :  { %458 = vmatprep.subr.mxu1 %v309_v28  ;;  %v221_v28 = vunpack.c.l.s4 %v634_v27 }
  0x4c   :  { %459 = vmatpush3.msra.mxu1 %v293_v29 }
  0x4d   :  { %460 = vmatprep.subr.mxu1 %v308_v30  ;;  %v222_v29 = vunpack.c.0.s8 %v221_v28 }
  0x4e   :  { %461 = vmatpush3.msra.mxu1 %v292_v31 }
  0x4f   :  { %462 = vmatprep.subr.mxu1 %v307_v32  ;;  %v225_v31 = vsub.s32 %v222_v29, %v91_v43 }
  0x50   :  { %463 = vmatpush3.msra.mxu1 %v291_v33 }
  0x51   :  { %464 = vmatprep.subr.mxu1 %v306_v34 }
  0x52   :  { %465 = vmatpush3.msra.mxu1 %v290_v35  ;;  %v78_v35 = vld [vmem:[#allocation7 + $0x1] ss:$4 sm:$0x3] }
  0x53   :  { %466 = vmatprep.subr.mxu1 %v305_v36 }
  0x54   :  { %467 = vmatpush3.msra.mxu1 %v289_v37 }
  0x55   :  { %468 = vmatprep.subr.mxu1 %v304_v38 }
  0x56   :  { %469 = vmatpush3.msra.mxu1 %v288_v39 }
  0x57   :  { %470 = vmatprep.subr.mxu1 %v303_v40 }
  0x58   :  { %471 = vmatpush3.msra.mxu1 %v287_v41 }
  0xfe   :  { %v170_v49 = vpop.f32.mrf.mxu0 }
  0xff   :  { %v690_v50 = vadd.f32 %v170_v49, %v93_v47  ;;  %v80_v47 = vld [vmem:[#allocation7 + $0x2] ss:$4 sm:$0x3] }
 0x100   :  { %v172_v51 = vpop.f32.mrf.mxu0 }
 0x101   :  { %v177_v52 = vrot.slane %v690_v50, 4  ;;  %v191_v53 = vmul.f32 %v690_v50, %v690_v50  ;;  %175 = vst [vmem:[#allocation10] sm:$0xff] %v690_v50  ;;  %v173_v54 = vadd.f32 %v172_v51, %v97_v48 }
 0x103   :  { %v178_v55 = vadd.f32 %v177_v52, %v690_v50  ;;  %v193_v56 = vrot.slane %v191_v53, 4  ;;  %v183_v57 = vrot.slane %v173_v54, 4  ;;  %v192_v58 = vmul.f32 %v173_v54, %v173_v54  ;;  %176 = vst [vmem:[#allocation10 + $0x8] sm:$0xff] %v173_v54 }
 0x105   :  { %v179_v59 = vrot.slane %v178_v55, 2  ;;  %v194_v60 = vadd.f32 %v193_v56, %v191_v53  ;;  %v184_v61 = vadd.f32 %v183_v57, %v173_v54  ;;  %v199_v62 = vrot.slane %v192_v58, 4 }
 0x107   :  { %v180_v63 = vadd.f32 %v179_v59, %v178_v55  ;;  %v195_v0 = vrot.slane %v194_v60, 2  ;;  %v200_v1 = vadd.f32 %v199_v62, %v192_v58  ;;  %v185_v2 = vrot.slane %v184_v61, 2  ;;  %v439_v62 = vld [vmem:[%s715_s4] ss:$0 sm:$0xff] }
 0x109   :  { %v196_v3 = vadd.f32 %v195_v0, %v194_v60  ;;  %v201_v4 = vrot.slane %v200_v1, 2  ;;  %v181_v5 = vrot.slane %v180_v63, 1  ;;  %v186_v6 = vadd.f32 %v185_v2, %v184_v61 }
 0x10b   :  { %v197_v7 = vrot.slane %v196_v3, 1  ;;  %v202_v8 = vadd.f32 %v201_v4, %v200_v1  ;;  %v182_v9 = vadd.f32 %v181_v5, %v180_v63  ;;  %v187_v10 = vrot.slane %v186_v6, 1 }
 0x10d   :  { %v198_v11 = vadd.f32 %v197_v7, %v196_v3  ;;  %v188_v12 = vadd.f32 %v187_v10, %v186_v6  ;;  %v189_v13 = vmul.f32 0.125, %v182_v9  ;;  %v203_v14 = vrot.slane %v202_v8, 1 }
 0x10f   :  { %v205_v15 = vmul.f32 0.125, %v198_v11  ;;  %v190_v16 = vmul.f32 0.125, %v188_v12  ;;  %v204_v17 = vadd.f32 %v203_v14, %v202_v8  ;;  %v207_v18 = vmul.f32 %v189_v13, %v189_v13 }
 0x111   :  { %v206_v19 = vmul.f32 0.125, %v204_v17  ;;  %v208_v20 = vmul.f32 %v190_v16, %v190_v16  ;;  %v209_v21 = vsub.f32 %v205_v15, %v207_v18 }
 0x113   :  { %v210_v22 = vsub.f32 %v206_v19, %v208_v20  ;;  %v211_v23 = vmax.f32 %v209_v21, 0.0 }
 0x115   :  { %v212_v24 = vmax.f32 %v210_v22, 0.0  ;;  %v213_v25 = vadd.f32 1e-05, %v211_v23 }
 0x117   :  { %v214_v26 = vadd.f32 1e-05, %v212_v24  ;;  %487 = vrsqrt.f32 %v213_v25 }
 0x119   :  { %489 = vrsqrt.f32 %v214_v26 }
 0x124   :  { %v488_v30 = vpop.eup %487 }
 0x126   :  { %v490_v32 = vpop.eup %489 }
 0x127   :  { %v219_v33 = vcombine.low %v488_v30, %v490_v32 }
 0x129   :  { %v226_v34 = vrot.slane %v219_v33, %v225_v31 }
 0x12b   :  { %v233_v36 = vrot.slane %v226_v34, %v225_v31 }
 0x12d   :  { %v235_v37 = vmul.f32 %v233_v36, %v78_v35 }
 0x12f   :  { %v240_v38 = vrot.slane %v235_v37, %v684_v44  ;;  %v244_v39 = vrot.slane %v235_v37, %v686_v46 }
 0x131   :  { %v247_v40 = vmul.f32 %v240_v38, %v189_v13  ;;  %v248_v41 = vmul.f32 %v244_v39, %v190_v16  ;;  %v269_v51 = vmul.f32 %v244_v39, %v173_v54  ;;  %v268_v52 = vmul.f32 %v240_v38, %v690_v50 }
 0x133   :  { %v251_v42 = vcombine.low %v247_v40, %v248_v41 }
 0x135   :  { %v258_v45 = vrot.slane %v251_v42, %v225_v31 }
 0x137   :  { %v265_v48 = vrot.slane %v258_v45, %v225_v31 }
 0x139   :  { %v267_v49 = vsub.f32 %v80_v47, %v265_v48 }
 0x13b   :  { %v278_v43 = vrot.slane %v267_v49, %v686_v46  ;;  %v274_v53 = vrot.slane %v267_v49, %v684_v44 }
 0x13d   :  { %v282_v55 = vadd.f32 %v278_v43, %v269_v51  ;;  %v281_v56 = vadd.f32 %v274_v53, %v268_v52 }
 0x13f   :  { %v284_v57 = vmul.f32 0.2, %v282_v55  ;;  %v283_v58 = vmul.f32 0.2, %v281_v56 }
 0x141   :  { %v286_v59 = vmax.f32 %v282_v55, %v284_v57  ;;  %v285_v60 = vmax.f32 %v281_v56, %v283_v58 }
 0x143   :  { %390 = vmatprep.mubr.f32.mxu1 %v286_v59 }
 0x144   :  { %391 = vmatmul.mubr.f32.vlgmr.msra.gmra.mxu1 %v285_v60 }
 0x204   :  { %v472_v61 = vpop.f32.mrf.mxu1 }
 0x206   :  { %v473_v54 = vpop.f32.mrf.mxu1 }
 0x207   :  { %v474_v63 = vadd.f32 %v473_v54, %v472_v61 }
 0x209   :  { %v393_v46 = vadd.f32 %v474_v63, %v439_v62 }
 0x20b   :  { %405 = vst [vmem:[#allocation11] sm:$0xff] %v393_v46  ;;  %396 = vmax.xlane.f32.xlu0 %v393_v46 }
 0x294   :  { %v397_v50 = vpop.xlane.xlu0 %396 }
 0x295   :  { %v398_v44 = vsub.f32 %v393_v46, %v397_v50 }
 0x297   :  { %v399_v0 = vmul.f32 1.442695, %v398_v44 }
 0x299   :  { %491 = vpow2.f32 %v399_v0 }
 0x2a6   :  { %v492_v1 = vpop.eup %491 }
 0x2a7   :  { %401 = vadd.xlane.f32.xlu0 %v492_v1 }
 0x2a8   :  { %586 = shalt.err (!%p583_p10)
}
 0x2a9   :  { %416 = dma.vmem_to_hbm [thread:$0]  %s414_s20, 256, %s716_s5, [#allocation4]  }
 0x2aa   :  { %s636_s23 = smov [#allocation11]  }
 0x2ab   :  { %s423_s24 = sshll.u32 %s636_s23, 4  ;;  %s424_s24 = int_to_ptr.vmem [resolvable:$true] %s423_s24 }
 0x2ac   :  { %s595_s25 = scalar_lea.vmem %s424_s24, 256  ;;  %p600_p12 = scmp.lt.s32.totalorder %s424_s24, %s424_s24 }
 0x2ad   :  { %p596_p11 = scmp.ne.s32.totalorder %s424_s24, %s595_s25  ;;  %p601_p13 = scmp.lt.s32.totalorder %s595_s25, %s595_s25 }
 0x2af   :  { %p602_p0 = por %p601_p13, %p600_p12 }
 0x2b1   :  { %p603_p1 = pnand %p602_p0, %p596_p11 }
 0x330   :  { %v402_v2 = vpop.xlane.xlu0 %401 }
 0x331   :  { %493 = vrcp.f32 %v402_v2 }
 0x33e   :  { %v494_v3 = vpop.eup %493 }
 0x33f   :  { %v404_v4 = vmul.f32 %v494_v3, %v492_v1 }
 0x341   :  { %406 = vst [vmem:[#allocation11 + $0x8] sm:$0xff] %v404_v4 }
 0x342   :  { %606 = shalt.err (!%p603_p1)
}
 0x343   :  { %426 = dma.vmem_to_hbm [thread:$0]  %s424_s24, 256, %s717_s6, [#allocation12]  }
 0x344   :  { %621 = dma.done.wait [#allocation4], 256  }
 0x345   :  { %622 = vsyncadd [#allocation4], 4294967040 }
 0x346   :  { %623 = dma.done.wait [#allocation12], 256  }
 0x347   :  { %624 = vsyncadd [#allocation12], 4294967040 }
 0x348   :  { %433 = vsyncpa [#allocation3], 1 }
 0x349   :  { %434 = vsyncpa [#allocation6], 1 }
 0x34a   :  { %435 = vsyncpa [#allocation9], 1 }
 0x34b   :  { %436 = vsyncpa [#allocation4], 1 }
 0x34c   :  { %437 = vsyncpa [#allocation12], 1 }

</bundles_post_ra>
